<compile_context>
chip_gen: v5e
topology: v5e:2x2
jax: 0.10.0
libtpu: 0.0.40
codegen_flags: <defaults>
</compile_context>

<pallas_src>
import jax
import jax.numpy as jnp
from jax.experimental import pallas as pl
from jax.experimental.pallas import tpu as pltpu


def _copy_kernel(x_ref, o_ref):
    # Identity forward: Buffer base class defines no transformation.
    o_ref[...] = x_ref[...]


_LANE = 1024                         # lane-dense last dim (multiple of 128)
_TARGET_BLOCK_BYTES = 2 * 1024 * 1024  # ~2 MiB blocks: safe on v5e/v6e/v7x


def buffer_forward(x: jax.Array) -> jax.Array:
    """Pallas implementation of Buffer.forward (identity pass-through).

    Accepts an array of any shape, returns an array with identical
    shape/dtype/values.
    """
    orig_shape = x.shape
    dtype = x.dtype
    itemsize = jnp.dtype(dtype).itemsize
    # Sublane packing: 8 rows/vreg for 32-bit, 16 for 16-bit, 32 for 8-bit.
    sublane = {4: 8, 2: 16, 1: 32}.get(itemsize, 8)

    total = x.size
    if total == 0:
        return x

    rows = pl.cdiv(total, _LANE)

    # Block rows sized to ~2 MiB, rounded down to a sublane multiple.
    target_rows = max(
        sublane,
        (_TARGET_BLOCK_BYTES // (_LANE * itemsize)) // sublane * sublane,
    )

    if rows <= target_rows:
        # Single block; block first dim == full array first dim satisfies the
        # (8,128) block constraint regardless of divisibility.
        tile_r = rows
        rows_padded = rows
    else:
        tile_r = target_rows
        rows_padded = pl.cdiv(rows, tile_r) * tile_r

    pad = rows_padded * _LANE - total
    x_flat = x.reshape(-1)
    if pad:
        x_flat = jnp.pad(x_flat, (0, pad))
    x2d = x_flat.reshape(rows_padded, _LANE)

    grid = (rows_padded // tile_r,)
    nbytes = rows_padded * _LANE * itemsize

    out2d = pl.pallas_call(
        _copy_kernel,
        out_shape=jax.ShapeDtypeStruct((rows_padded, _LANE), dtype),
        grid_spec=pltpu.PrefetchScalarGridSpec(
            num_scalar_prefetch=0,
            grid=grid,
            in_specs=[pl.BlockSpec((tile_r, _LANE), lambda i: (i, 0))],
            out_specs=pl.BlockSpec((tile_r, _LANE), lambda i: (i, 0)),
        ),
        compiler_params=pltpu.CompilerParams(
            dimension_semantics=("parallel",),
            vmem_limit_bytes=32 * 1024 * 1024,
        ),
        cost_estimate=pl.CostEstimate(
            flops=0, transcendentals=0, bytes_accessed=2 * nbytes),
    )(x2d)

    out_flat = out2d.reshape(-1)
    if pad:
        out_flat = out_flat[:total]
    return out_flat.reshape(orig_shape)


# TODO(synk): Buffer is an abstract base class (forward is @abstractmethod);
# there is no concrete computation to translate beyond the identity contract.
# For production, the zero-cost option is to return x directly (or alias
# input/output) and skip the copy entirely.

if __name__ == "__main__":
    key = jax.random.PRNGKey(0)

    # NCHW example input consistent with a conv-style Buffer subclass.
    x = jax.random.normal(key, (2, 4, 16, 16), dtype=jnp.float32)
    y = buffer_forward(x)
    jax.block_until_ready(y)
    assert y.shape == x.shape and y.dtype == x.dtype
    assert bool(jnp.allclose(y, x)), "Buffer identity forward mismatch (f32)"

    # Ragged shape + bf16 to exercise the padding / dtype-aware path.
    x2 = jax.random.normal(key, (2, 3, 5, 7), dtype=jnp.bfloat16)
    y2 = buffer_forward(x2)
    jax.block_until_ready(y2)
    assert y2.shape == x2.shape and y2.dtype == x2.dtype
    assert bool(jnp.all(y2 == x2)), "Buffer identity forward mismatch (bf16)"

    print("KERNEL_OK")
</pallas_src>

<mosaic_0001>
module attributes {stable_mosaic.version = 11 : i64} {
  func.func @_copy_kernel(%arg0: i32, %arg1: memref<2x1024xf32, #tpu.memory_space<vmem>>, %arg2: memref<2x1024xf32, #tpu.memory_space<vmem>>) attributes {dimension_semantics = [#tpu.dimension_semantics<parallel>], iteration_bounds = array<i64: 1>, scalar_prefetch = 0 : i64, scratch_operands = 0 : i64, tpu.core_type = #tpu.core_type<tc>, window_params = [{transform_indices = @transform_0, window_bounds = array<i64: 2, 1024>}, {transform_indices = @transform_1, window_bounds = array<i64: 2, 1024>}]} {
    %c0 = arith.constant 0 : index
    %c0_0 = arith.constant 0 : index
    %0 = vector.load %arg1[%c0, %c0_0] : memref<2x1024xf32, #tpu.memory_space<vmem>>, vector<2x1024xf32>
    %c0_1 = arith.constant 0 : index
    %c0_2 = arith.constant 0 : index
    %1 = vector.load %arg2[%c0_1, %c0_2] : memref<2x1024xf32, #tpu.memory_space<vmem>>, vector<2x1024xf32>
    tpu.vector_store %arg2[%c0_1, %c0_2], %0 {strides = array<i32>} : memref<2x1024xf32, #tpu.memory_space<vmem>>, vector<2x1024xf32>,
    return
  }
  func.func @transform_0(%arg0: i32) -> (i32, i32) {
    %c0_i32 = arith.constant 0 : i32
    %c0_i32_0 = arith.constant 0 : i32
    return %arg0, %c0_i32 : i32, i32
  }
  func.func @transform_1(%arg0: i32) -> (i32, i32) {
    %c0_i32 = arith.constant 0 : i32
    %c0_i32_0 = arith.constant 0 : i32
    return %arg0, %c0_i32 : i32, i32
  }
}

</mosaic_0001>

<bundles_post_ra>
// kernel: tpu_custom_call.1
= control target key start
LH: loop header
LB: loop body
LE: loop exit
PB: predicated region body
PF: predicated region fallthrough
CT: control target
= control target key end

     0   :  { %6 = vsyncpa [#allocation3], 0  ;;  %s116_s0 = inlined_call_operand.hbm [shape: f32[2,1024], index: 0, kind: input, shape index: {}]   ;;  %s117_s1 = inlined_call_operand.hbm [shape: f32[2,1024], index: 1, kind: output, shape index: {}]  }
   0x1   :  { %7 = vsyncpa [#allocation4], 0  ;;  %s13_s8 = sshll.u32 %s116_s0, 4  ;;  %s98_s9 = smov [#allocation2]   ;;  %s14_s8 = int_to_ptr.hbm [resolvable:$true] %s13_s8 }
   0x2   :  { %s15_s10 = sshll.u32 %s98_s9, 4  ;;  %s16_s10 = int_to_ptr.vmem [resolvable:$true] %s15_s10 }
   0x3   :  { %18 = dma.hbm_to_vmem [thread:$0]  %s14_s8, 256, %s16_s10, [#allocation3]  }
   0x4   :  { %94 = dma.done.wait [#allocation3], 256  }
   0x5   :  { %95 = vsyncadd [#allocation3], 4294967040  ;;  %s99_s11 = smov [#allocation5]   ;;  %s34_s15 = sshll.u32 %s117_s1, 4  ;;  %v23_v0 = vld [vmem:[#allocation2] sm:$0xff]  ;;  %v24_v1 = vld [vmem:[#allocation2 + $0x8] sm:$0xff]  ;;  %s35_s15 = int_to_ptr.hbm [resolvable:$true] %s34_s15 }
   0x6   :  { %s32_s12 = sshll.u32 %s99_s11, 4  ;;  %25 = vst [vmem:[#allocation5] sm:$0xff] %v23_v0  ;;  %s33_s12 = int_to_ptr.vmem [resolvable:$true] %s32_s12 }
   0x7   :  { %26 = vst [vmem:[#allocation5 + $0x8] sm:$0xff] %v24_v1 }
   0x8   :  { %37 = dma.vmem_to_hbm [thread:$0]  %s33_s12, 256, %s35_s15, [#allocation4]  }
   0x9   :  { %96 = dma.done.wait [#allocation4], 256  }
   0xa   :  { %97 = vsyncadd [#allocation4], 4294967040 }
   0xb   :  { %42 = vsyncpa [#allocation3], 1 }
   0xc   :  { %43 = vsyncpa [#allocation4], 1 }

</bundles_post_ra>
